<compile_context>
chip_gen: v6e
topology: v6e:2x2x1
jax: 0.10.0
libtpu: 0.0.40
codegen_flags: <defaults>
</compile_context>

<pallas_src>
import functools

import jax
import jax.numpy as jnp
from jax.experimental import pallas as pl
from jax.experimental.pallas import tpu as pltpu


# --------------------------------------------------------------------------- #
# Kernel body
# --------------------------------------------------------------------------- #
def _embed_layernorm_kernel(x_ref, pos_ref, gamma_ref, beta_ref, o_ref, *, eps):
    """One grid step: (g_rows, l_tile, E) rows -> + pos table -> LayerNorm over E."""
    x = x_ref[...].astype(jnp.float32)                 # (g_rows, l_tile, E)
    p = pos_ref[...].astype(jnp.float32)               # (l_tile, E)
    h = x + p[None, :, :]

    mean = jnp.mean(h, axis=-1, keepdims=True)         # (g_rows, l_tile, 1)
    cent = h - mean
    var = jnp.mean(cent * cent, axis=-1, keepdims=True)
    inv = jax.lax.rsqrt(var + eps)                     # EUP rsqrt, not a VPU divide

    g = gamma_ref[...].astype(jnp.float32)[None, :, :]  # (1, 1, E)
    b = beta_ref[...].astype(jnp.float32)[None, :, :]
    o_ref[...] = (cent * inv * g + b).astype(o_ref.dtype)


# --------------------------------------------------------------------------- #
# Generation-aware VMEM budgeting + tile picking
# --------------------------------------------------------------------------- #
def _vmem_budgets():
    """(pipeline_budget_bytes, vmem_limit_bytes) sized for the current TPU gen."""
    try:
        cap = int(getattr(pltpu.get_tpu_info(), "vmem_capacity_bytes", 64 << 20))
    except Exception:
        cap = 64 << 20  # conservative: assume a v7x-class 64 MiB/TC part
    if cap <= (64 << 20):
        # v7x: 64 MiB physical per TensorCore -> stay well under the ceiling.
        return 40 << 20, 48 << 20
    # v5e / v6e: 128 MiB physical; raise the scoped limit well above the
    # 16/32 MiB defaults so the fat tiles are legal.
    return 72 << 20, 96 << 20


def _pick_tiles(n_rows, L, E, itemsize, pipeline_budget, *, min_steps=4):
    """Pick (g_rows, l_tile) so that double-buffered in/out blocks, the resident
    pos/gamma/beta blocks and ~4 block-sized f32 temporaries fit the budget,
    while keeping >= min_steps grid steps (megacore + pipelining)."""
    sublane = max(8, 32 // max(1, itemsize))           # 8 (f32), 16 (bf16), 32 (i8)
    per_elem = 4 * itemsize + 16                       # 2x in + 2x out blocks + f32 temps

    # ---- branch 1: whole (L, E) slab per row, group several rows per step ----
    resident = 2 * L * E * itemsize + 8 * E * 4        # pos (double-buffered) + gamma/beta
    avail = pipeline_budget - resident
    g_by_budget = avail // max(1, L * E * per_elem) if avail > 0 else 0
    if g_by_budget >= 1:
        g_by_steps = -(-n_rows // min_steps)           # ceil: keep >= min_steps steps
        g_rows = int(max(1, min(n_rows, g_by_budget, g_by_steps)))
        return g_rows, L

    # ---- branch 2: a single (L, E) row is too big -> tile L as well ----------
    per_elem2 = 6 * itemsize + 16                      # + pos block, also double-buffered
    l_tile = pipeline_budget // max(1, E * per_elem2)
    l_tile = max(sublane, (l_tile // sublane) * sublane)
    l_tile = int(min(l_tile, L))
    return 1, l_tile


# --------------------------------------------------------------------------- #
# Public forward
# --------------------------------------------------------------------------- #
def embedding_forward(x, pos_table, gamma, beta, *, embedding_type="T", eps=1e-5):
    """Forward pass of the PyTorch `Embedding` module.

    embedding_type == 'T': x is (B, embedding_dim, features, x_len)
                           -> output (B, features, x_len, embedding_dim)
    otherwise            : x is (B, x_len, embedding_dim) -> same shape
    pos_table: (x_len, embedding_dim) nn.Embedding weight (rows 0..x_len-1).
    gamma, beta: (embedding_dim,) LayerNorm affine parameters.
    """
    L, E = pos_table.shape
    if embedding_type == "T":
        B, E2, F, L2 = x.shape
        assert (E2, L2) == (E, L)
        # Layout plumbing: present rows as (B*F, L, E) so the pos table broadcasts
        # over a whole (l_tile, E) slab per row group.
        # TODO(synk): fuse this permute into the BlockSpec (see header note).
        xf = jnp.transpose(x, (0, 2, 3, 1)).reshape(B * F, L, E)
        out_shape = (B, F, L, E)
    else:
        B, L2, E2 = x.shape
        assert (L2, E2) == (L, E)
        xf = x
        out_shape = (B, L, E)

    n_rows = xf.shape[0]
    itemsize = jnp.dtype(x.dtype).itemsize
    pipeline_budget, vmem_limit = _vmem_budgets()
    g_rows, l_tile = _pick_tiles(n_rows, L, E, itemsize, pipeline_budget)

    grid = (pl.cdiv(n_rows, g_rows), pl.cdiv(L, l_tile))

    kernel = functools.partial(_embed_layernorm_kernel, eps=eps)
    out = pl.pallas_call(
        kernel,
        out_shape=jax.ShapeDtypeStruct((n_rows, L, E), x.dtype),
        grid_spec=pltpu.PrefetchScalarGridSpec(
            num_scalar_prefetch=0,
            grid=grid,
            in_specs=[
                pl.BlockSpec((g_rows, l_tile, E), lambda i, j: (i, j, 0)),  # activations
                pl.BlockSpec((l_tile, E), lambda i, j: (j, 0)),             # pos table
                pl.BlockSpec((1, E), lambda i, j: (0, 0)),                  # LayerNorm gamma
                pl.BlockSpec((1, E), lambda i, j: (0, 0)),                  # LayerNorm beta
            ],
            out_specs=pl.BlockSpec((g_rows, l_tile, E), lambda i, j: (i, j, 0)),
        ),
        compiler_params=pltpu.CompilerParams(
            dimension_semantics=("parallel", "parallel"),
            vmem_limit_bytes=int(vmem_limit),
        ),
    )(xf, pos_table, gamma.reshape(1, E), beta.reshape(1, E))

    return out.reshape(out_shape)


# --------------------------------------------------------------------------- #
# Pure-JAX reference + self-check
# --------------------------------------------------------------------------- #
def _reference(x, pos_table, gamma, beta, *, embedding_type="T", eps=1e-5):
    if embedding_type == "T":
        h = jnp.transpose(x, (0, 2, 3, 1)) + pos_table[None, None, :, :]
    else:
        h = x + pos_table[None, :, :]
    mean = jnp.mean(h, axis=-1, keepdims=True)
    var = jnp.mean((h - mean) ** 2, axis=-1, keepdims=True)
    return (h - mean) / jnp.sqrt(var + eps) * gamma + beta


if __name__ == "__main__":
    # batch=2, embedding_dim=32, features=4, x_len=16  ('T' path shapes).
    B, E, F, L = 2, 32, 4, 16
    key = jax.random.PRNGKey(0)
    kx, kw, kg, kb, kx2 = jax.random.split(key, 5)

    x = jax.random.normal(kx, (B, E, F, L), dtype=jnp.float32)
    pos_table = jax.random.normal(kw, (L, E), dtype=jnp.float32)        # nn.Embedding weight
    gamma = 1.0 + 0.1 * jax.random.normal(kg, (E,), dtype=jnp.float32)  # LayerNorm weight
    beta = 0.1 * jax.random.normal(kb, (E,), dtype=jnp.float32)         # LayerNorm bias

    out = jax.block_until_ready(
        embedding_forward(x, pos_table, gamma, beta, embedding_type="T"))
    ref = _reference(x, pos_table, gamma, beta, embedding_type="T")
    assert out.shape == (B, F, L, E)
    assert jnp.allclose(out, ref, atol=1e-4, rtol=1e-4), "mismatch vs reference ('T' path)"

    # Non-'T' path: x is (B, x_len, embedding_dim).
    x2 = jax.random.normal(kx2, (B, L, E), dtype=jnp.float32)
    out2 = jax.block_until_ready(
        embedding_forward(x2, pos_table, gamma, beta, embedding_type="F"))
    ref2 = _reference(x2, pos_table, gamma, beta, embedding_type="F")
    assert out2.shape == (B, L, E)
    assert jnp.allclose(out2, ref2, atol=1e-4, rtol=1e-4), "mismatch vs reference (non-'T' path)"

    print("KERNEL_OK")
</pallas_src>

<mosaic_0001>
module attributes {stable_mosaic.version = 11 : i64} {
  func.func @_embed_layernorm_kernel(%arg0: i32, %arg1: i32, %arg2: memref<2x16x32xf32, #tpu.memory_space<vmem>>, %arg3: memref<16x32xf32, #tpu.memory_space<vmem>>, %arg4: memref<1x32xf32, #tpu.memory_space<vmem>>, %arg5: memref<1x32xf32, #tpu.memory_space<vmem>>, %arg6: memref<2x16x32xf32, #tpu.memory_space<vmem>>) attributes {dimension_semantics = [#tpu.dimension_semantics<parallel>, #tpu.dimension_semantics<parallel>], iteration_bounds = array<i64: 4, 1>, scalar_prefetch = 0 : i64, scratch_operands = 0 : i64, tpu.core_type = #tpu.core_type<tc>, window_params = [{transform_indices = @transform_0, window_bounds = array<i64: 2, 16, 32>}, {transform_indices = @transform_1, window_bounds = array<i64: 16, 32>}, {pipeline_mode = #tpu.pipeline_mode<synchronous>, transform_indices = @transform_2, window_bounds = array<i64: 1, 32>}, {pipeline_mode = #tpu.pipeline_mode<synchronous>, transform_indices = @transform_3, window_bounds = array<i64: 1, 32>}, {transform_indices = @transform_4, window_bounds = array<i64: 2, 16, 32>}]} {
    %c0 = arith.constant 0 : index
    %c0_0 = arith.constant 0 : index
    %c0_1 = arith.constant 0 : index
    %0 = vector.load %arg2[%c0, %c0_0, %c0_1] : memref<2x16x32xf32, #tpu.memory_space<vmem>>, vector<2x16x32xf32>
    %c0_2 = arith.constant 0 : index
    %c0_3 = arith.constant 0 : index
    %1 = vector.load %arg3[%c0_2, %c0_3] : memref<16x32xf32, #tpu.memory_space<vmem>>, vector<16x32xf32>
    %2 = vector.shape_cast %1 : vector<16x32xf32> to vector<1x16x32xf32>
    %3 = vector.broadcast %2 : vector<1x16x32xf32> to vector<2x16x32xf32>
    %4 = arith.addf %0, %3 : vector<2x16x32xf32>
    %cst = arith.constant dense<0.000000e+00> : vector<2x16xf32>
    %5 = vector.multi_reduction <add>, %4, %cst [2] : vector<2x16x32xf32> to vector<2x16xf32>
    %6 = vector.shape_cast %5 : vector<2x16xf32> to vector<2x16x1xf32>
    %cst_4 = arith.constant 3.200000e+01 : f32
    %7 = vector.broadcast %cst_4 : f32 to vector<2x16x1xf32>
    %8 = arith.divf %6, %7 : vector<2x16x1xf32>
    %9 = vector.broadcast %8 : vector<2x16x1xf32> to vector<2x16x32xf32>
    %10 = arith.subf %4, %9 : vector<2x16x32xf32>
    %11 = arith.mulf %10, %10 : vector<2x16x32xf32>
    %cst_5 = arith.constant dense<0.000000e+00> : vector<2x16xf32>
    %12 = vector.multi_reduction <add>, %11, %cst_5 [2] : vector<2x16x32xf32> to vector<2x16xf32>
    %13 = vector.shape_cast %12 : vector<2x16xf32> to vector<2x16x1xf32>
    %cst_6 = arith.constant 3.200000e+01 : f32
    %14 = vector.broadcast %cst_6 : f32 to vector<2x16x1xf32>
    %15 = arith.divf %13, %14 : vector<2x16x1xf32>
    %cst_7 = arith.constant 9.99999974E-6 : f32
    %16 = vector.broadcast %cst_7 : f32 to vector<2x16x1xf32>
    %17 = arith.addf %15, %16 : vector<2x16x1xf32>
    %18 = math.rsqrt %17 : vector<2x16x1xf32>
    %c0_8 = arith.constant 0 : index
    %c0_9 = arith.constant 0 : index
    %19 = vector.load %arg4[%c0_8, %c0_9] : memref<1x32xf32, #tpu.memory_space<vmem>>, vector<1x32xf32>
    %20 = vector.shape_cast %19 : vector<1x32xf32> to vector<1x1x32xf32>
    %c0_10 = arith.constant 0 : index
    %c0_11 = arith.constant 0 : index
    %21 = vector.load %arg5[%c0_10, %c0_11] : memref<1x32xf32, #tpu.memory_space<vmem>>, vector<1x32xf32>
    %22 = vector.shape_cast %21 : vector<1x32xf32> to vector<1x1x32xf32>
    %23 = vector.broadcast %18 : vector<2x16x1xf32> to vector<2x16x32xf32>
    %24 = arith.mulf %10, %23 : vector<2x16x32xf32>
    %25 = vector.broadcast %20 : vector<1x1x32xf32> to vector<2x16x32xf32>
    %26 = arith.mulf %24, %25 : vector<2x16x32xf32>
    %27 = vector.broadcast %22 : vector<1x1x32xf32> to vector<2x16x32xf32>
    %28 = arith.addf %26, %27 : vector<2x16x32xf32>
    %c0_12 = arith.constant 0 : index
    %c0_13 = arith.constant 0 : index
    %c0_14 = arith.constant 0 : index
    %29 = vector.load %arg6[%c0_12, %c0_13, %c0_14] : memref<2x16x32xf32, #tpu.memory_space<vmem>>, vector<2x16x32xf32>
    tpu.vector_store %arg6[%c0_12, %c0_13, %c0_14], %28 {strides = array<i32>} : memref<2x16x32xf32, #tpu.memory_space<vmem>>, vector<2x16x32xf32>,
    return
  }
  func.func @transform_0(%arg0: i32, %arg1: i32) -> (i32, i32, i32) {
    %c0_i32 = arith.constant 0 : i32
    %c0_i32_0 = arith.constant 0 : i32
    return %arg0, %arg1, %c0_i32 : i32, i32, i32
  }
  func.func @transform_1(%arg0: i32, %arg1: i32) -> (i32, i32) {
    %c0_i32 = arith.constant 0 : i32
    %c0_i32_0 = arith.constant 0 : i32
    return %arg1, %c0_i32 : i32, i32
  }
  func.func @transform_2(%arg0: i32, %arg1: i32) -> (i32, i32) {
    %c0_i32 = arith.constant 0 : i32
    %c0_i32_0 = arith.constant 0 : i32
    %c0_i32_1 = arith.constant 0 : i32
    return %c0_i32, %c0_i32_0 : i32, i32
  }
  func.func @transform_3(%arg0: i32, %arg1: i32) -> (i32, i32) {
    %c0_i32 = arith.constant 0 : i32
    %c0_i32_0 = arith.constant 0 : i32
    %c0_i32_1 = arith.constant 0 : i32
    return %c0_i32, %c0_i32_0 : i32, i32
  }
  func.func @transform_4(%arg0: i32, %arg1: i32) -> (i32, i32, i32) {
    %c0_i32 = arith.constant 0 : i32
    %c0_i32_0 = arith.constant 0 : i32
    return %arg0, %arg1, %c0_i32 : i32, i32, i32
  }
}

</mosaic_0001>

<bundles_post_ra>
// kernel: tpu_custom_call.1
= control target key start
LH: loop header
LB: loop body
LE: loop exit
PB: predicated region body
PF: predicated region fallthrough
CT: control target
= control target key end

     0   :  { %s958_s0 = inlined_call_operand.hbm [shape: f32[8,16,32], index: 0, kind: input, shape index: {}]   ;;  %s959_s1 = inlined_call_operand.hbm [shape: f32[16,32], index: 1, kind: input, shape index: {}]   ;;  %s960_s2 = inlined_call_operand.vmem [shape: f32[1,32], index: 2, kind: input, shape index: {}]   ;;  %s961_s3 = inlined_call_operand.vmem [shape: f32[1,32], index: 3, kind: input, shape index: {}]   ;;  %s962_s4 = inlined_call_operand.hbm [shape: f32[8,16,32], index: 4, kind: output, shape index: {}]  }
   0x1   :  { %966 = sst [smem:[#allocation11_spill]] %s959_s1 }
   0x2   :  { %9 = vsyncpa [#allocation3], 0 }
   0x3   :  { %11 = vsyncpa [#allocation3 + $0x1], 0 }
   0x4   :  { %12 = vsyncpa [#allocation6], 0 }
   0x5   :  { %13 = vsyncpa [#allocation4], 0 }
   0x6   :  { %15 = vsyncpa [#allocation4 + $0x1], 0  ;;  %s751_s15 = smov 0   ;;  %s753_s16 = smov 0  }
   0x7   :  { %s755_s17 = smov 0   ;;  %s757_s18 = smov 0  }
   0x8   :  { %s759_s19 = smov 0   ;;  %s761_s20 = smov 0  }
   0x9 LB: > { %s469_s21 = sadd.s32 4294967295, %s717_s20   ;;  %s470_s22 = sadd.s32 4294967294, %s717_s20   ;;  %s717_s20 = sphi %s761_s20, %s21_s20   ;;  %s713_s19 = sphi %s759_s19, %s985_s19   ;;  %s709_s18 = sphi %s757_s18, %s984_s18   ;;  %s705_s17 = sphi %s755_s17, %s983_s17   ;;  %s701_s16 = sphi %s753_s16, %s982_s16   ;;  %s697_s15 = sphi %s751_s15, %s981_s15  }
   0xa   : > { %p55_p0 = scmp.ne.s32.totalorder %s701_s16, %s697_s15  ;;  %p785_p1 = scmp.eq.s32.totalorder %s469_s21, 0 }
   0xb   : > { %p789_p2 = scmp.eq.s32.totalorder %s469_s21, 3  ;;  %p155_p3 = scmp.eq.s32.totalorder %s470_s22, 3 }
   0xc   : > { %p795_p4 = por %p785_p1, %p55_p0  ;;  %p471_p5 = scmp.ge.s32.totalorder %s717_s20, 1 }
   0xd   : > { %p800_p6 = por %p155_p3, %p55_p0  ;;  %p162_p7 = scmp.lt.s32.totalorder %s717_s20, 5 }
   0xe   : > { %s719_s28 = smov [#allocation5]   ;;  %s33_s5 = sadd.s32 1, %s713_s19 }
   0xf   : > { %s970_s26 = scalar_select %p800_p6, 1, 0 }
  0x10   : > { %p805_p8 = pnand %p471_p5, %p162_p7  ;;  %s177_s29 = sshll.u32 %s719_s28, 4  ;;  %s178_s29 = int_to_ptr.vmem [resolvable:$true] %s177_s29 }
  0x11   : > { %s590_s6 = scalar_lea.vmem %s178_s29, 256  ;;  %p598_p3 = scmp.lt.s32.totalorder %s178_s29, %s178_s29 }
  0x12   : > { %p502_p9 = pneg %p805_p8  ;;  %p591_p12 = scmp.ne.s32.totalorder %s178_s29, %s590_s6 }
  0x13   : > { %p599_p5 = scmp.lt.s32.totalorder %s590_s6, %s590_s6 }
  0x14   : > { %p813_p10 = pnand %p502_p9, %p785_p1 }
  0x15   : > { %p600_p7 = por %p599_p5, %p598_p3 }
  0x16   : > { %p581_p11 = pneg %p813_p10 }
  0x18   : > { %p593_p13 = pnand %p591_p12, %p581_p11 }
  0x1a   : > { %p594_p0 = pneg %p593_p13 }
  0x1c   : > { %p601_p6 = pnand %p600_p7, %p594_p0 }
  0x1e   : > { %604 = shalt.err (!%p601_p6)
}
  0x1f   : > { %s963_s7 = smov 128   ;;  %s964_s8 = smov 8  }
  0x20   : > { %s973_s1 = sld [smem:[#allocation11_spill]]  ;;  %p35_p6 = scmp.ge.s32.totalorder %s33_s5, 4 }
  0x21   : > { %s42_s11 = sadd.s32 1, %s705_s17  ;;  %p49_p9 = scmp.ne.s32.totalorder %s705_s17, %s701_s16 }
  0x22   : > { %p50_p11 = scmp.eq.s32.totalorder %s717_s20, 0  ;;  %s987_s5 = smov (%p35_p6, %s33_s5), 0 }
  0x23   : > { %p840_p13 = por %p789_p2, %p49_p9  ;;  %s37_s14 = ssub.s32 %s713_s19, %s987_s5 }
  0x24   : > { %p834_p12 = por %p50_p11, %p49_p9  ;;  %p515_p0 = scmp.lt.s32.totalorder %s717_s20, 4 }
  0x25   : > { %s975_s13 = scalar_select %p840_p13, 1, 0 }
  0x26   : > { %505 = dma.hbm_to_vmem [thread:$0]  (!%p813_p10), %s973_s1, 256, %s178_s29, [#allocation6], %s963_s7, %s963_s7, %s964_s8  }
  0x27   : > { %p40_p10 = scmp.eq.s32.totalorder %s37_s14, 0  ;;  %s197_s21 = sand.u32 1, %s705_s17  }
  0x28   : > { %s474_s22 = sshll.u32 %s197_s21, 5  ;;  %s491_s29 = sshll.u32 %s713_s19, 9 }
  0x29   : > { %s849_s28 = scalar_select %p40_p10, %s705_s17, %s42_s11  }
  0x2a   : > { %s210_s9 = scalar_lea.hbm %s958_s0, %s491_s29  ;;  %s201_s10 = scalar_lea.vmem [#allocation2], %s474_s22 }
  0x2b   : > { %s211_s7 = sshll.u32 %s201_s10, 4  ;;  %p857_p2 = pnand %p515_p0, %p834_p12  ;;  %s212_s7 = int_to_ptr.vmem [resolvable:$true] %s211_s7 }
  0x2c   : > { %s198_s8 = scalar_lea.sflag [#allocation3], %s197_s21  ;;  %s618_s14 = scalar_lea.vmem %s212_s7, 512 }
  0x2d   : > { %p607_p3 = pneg %p857_p2  ;;  %p619_p5 = scmp.ne.s32.totalorder %s212_s7, %s618_s14 }
  0x2e   : > { %s722_s11 = smov [#allocation2]  }
  0x2f   : > { %p621_p7 = pnand %p619_p5, %p607_p3  ;;  %s623_s1 = sshll.u32 %s722_s11, 4  ;;  %s624_s1 = int_to_ptr.vmem [resolvable:$false] %s623_s1 }
  0x30   : > { %s625_s29 = scalar_lea.vmem %s624_s1, 1024  ;;  %p626_p9 = scmp.lt.s32.totalorder %s212_s7, %s624_s1 }
  0x31   : > { %p622_p6 = pneg %p621_p7  ;;  %p627_p11 = scmp.lt.s32.totalorder %s625_s29, %s618_s14 }
  0x33   : > { %p628_p10 = por %p627_p11, %p626_p9 }
  0x35   : > { %p629_p13 = pnand %p628_p10, %p622_p6 }
  0x37   : > { %632 = shalt.err (!%p629_p13)
}
  0x38   : > { %s977_s12 = smov 8   ;;  %s978_s22 = smov 128  }
  0x39   : > { %509 = dma.hbm_to_vmem [thread:$0]  (!%p857_p2), %s210_s9, 512, %s212_s7, %s198_s8, %s978_s22, %s978_s22, %s977_s12  }
  0x3a   : > { %223 = sbr.rel (%p805_p8) target bundleno = 400 (0x190), region = 36  ;;  %s871_s21 = sand.u32 (!%p805_p8), 1, %s701_s16  }
  0x3b   : > { %s479_s1 = sshll.u32 (!%p805_p8), %s871_s21, 5  ;;  %s226_s30 = scalar_lea.sflag (!%p805_p8), [#allocation3], %s871_s21 }
  0x3c   : > { %s229_s6 = scalar_lea.vmem (!%p805_p8), [#allocation2], %s479_s1 }
  0x3f   : > { %684 = dma.done.wait (%p795_p4), %s226_s30, 512  }
  0x40   : > { %686 = vsyncadd (%p795_p4), %s226_s30, 4294966784 }
  0x41   : > { %688 = dma.done.wait (%p785_p1), [#allocation6], 256  }
  0x42   : > { %690 = vsyncadd (%p785_p1), [#allocation6], 4294967040  ;;  %v263_v0 = vld [vmem:[%s229_s6] sm:$0xff]  ;;  %vm273_vm0 = vcmask 261120   ;;  %v265_v2 = vld [vmem:[%s229_s6 + $0x10] sm:$0xff]  ;;  %s257_s8 = scalar_lea.vmem [#allocation7], %s479_s1 }
  0x43   : > { %v267_v1 = vld [vmem:[#allocation5] sm:$0xff]  ;;  %v264_v5 = vld [vmem:[%s229_s6 + $0x8] sm:$0xff]  ;;  %v266_v7 = vld [vmem:[%s229_s6 + $0x18] sm:$0xff]  ;;  %s493_s9 = sshll.u32 %s709_s18, 9  ;;  %s370_s10 = sshll.u32 %s257_s8, 4  ;;  %s910_s10 = int_to_ptr.vmem [resolvable:$true] %s370_s10 }
  0x44   : > { %v269_v3 = vadd.f32 %v267_v1, %v263_v0  ;;  %v271_v4 = vadd.f32 %v267_v1, %v265_v2  ;;  %v268_v6 = vld [vmem:[#allocation5 + $0x8] sm:$0xff]  ;;  %v482_v47 = vld [vmem:[%s960_s2] ss:$0 sm:$0xff]  ;;  %s908_s11 = scalar_lea.hbm %s962_s4, %s493_s9  ;;  %s354_s18 = scalar_lea.sflag [#allocation4], %s871_s21 }
  0x45   : > { %v270_v8 = vadd.f32 %v268_v6, %v264_v5  ;;  %v272_v9 = vadd.f32 %v268_v6, %v266_v7  ;;  %v483_v49 = vld [vmem:[%s961_s3] ss:$0 sm:$0xff]  ;;  %s633_s29 = scalar_lea.vmem %s910_s10, 512  ;;  %p979_p4 = scmp.ne.s32.totalorder %s975_s13, 0 }
  0x46   : > { %v274_v10 = vsel %vm273_vm0, %v269_v3, 0.0  ;;  %v280_v11 = vsel %vm273_vm0, %v271_v4, 0.0  ;;  %p634_p1 = scmp.ne.s32.totalorder %s910_s10, %s633_s29  ;;  %s723_s12 = smov [#allocation7]  }
  0x47   : > { %275 = vadd.xlane.f32.xlu0 %v274_v10  ;;  %281 = vadd.xlane.f32.xlu1 %v280_v11  ;;  %v277_v12 = vsel %vm273_vm0, %v270_v8, 0.0  ;;  %v283_v13 = vsel %vm273_vm0, %v272_v9, 0.0  ;;  %s637_s22 = sshll.u32 %s723_s12, 4  ;;  %s638_s22 = int_to_ptr.vmem [resolvable:$false] %s637_s22 }
  0x48   : > { %p635_p8 = pnand %p634_p1, %p979_p4  ;;  %s639_s1 = scalar_lea.vmem %s638_s22, 1024 }
  0x49   : > { %p640_p13 = scmp.lt.s32.totalorder %s910_s10, %s638_s22  ;;  %p641_p0 = scmp.lt.s32.totalorder %s639_s1, %s633_s29 }
  0x4a   : > { %p636_p12 = pneg %p635_p8 }
  0x4b   : > { %278 = vadd.xlane.f32.xlu0 %v277_v12  ;;  %284 = vadd.xlane.f32.xlu1 %v283_v13  ;;  %p642_p2 = por %p641_p0, %p640_p13 }
  0x4d   : > { %p643_p3 = pnand %p642_p2, %p636_p12 }
  0xd0   : > { %v276_v14 = vpop.xlane.xlu0 %275  ;;  %v282_v15 = vpop.xlane.xlu1 %281 }
  0xd1   : > { %v287_v16 = vmul.f32 0.03125, %v276_v14  ;;  %v289_v17 = vmul.f32 0.03125, %v282_v15 }
  0xd3   : > { %v291_v18 = vsub.f32 %v269_v3, %v287_v16  ;;  %v293_v19 = vsub.f32 %v271_v4, %v289_v17 }
  0xd4   : > { %v279_v20 = vpop.xlane.xlu0 %278  ;;  %v285_v21 = vpop.xlane.xlu1 %284 }
  0xd5   : > { %v288_v22 = vmul.f32 0.03125, %v279_v20  ;;  %v290_v23 = vmul.f32 0.03125, %v285_v21  ;;  %v295_v24 = vmul.f32 %v291_v18, %v291_v18  ;;  %v297_v25 = vmul.f32 %v293_v19, %v293_v19 }
  0xd7   : > { %v292_v26 = vsub.f32 %v270_v8, %v288_v22  ;;  %v294_v27 = vsub.f32 %v272_v9, %v290_v23  ;;  %v299_v28 = vsel %vm273_vm0, %v295_v24, 0.0  ;;  %v305_v29 = vsel %vm273_vm0, %v297_v25, 0.0 }
  0xd8   : > { %300 = vadd.xlane.f32.xlu0 %v299_v28 }
  0xd9   : > { %v296_v30 = vmul.f32 %v292_v26, %v292_v26  ;;  %v298_v31 = vmul.f32 %v294_v27, %v294_v27 }
  0xdb   : > { %v302_v32 = vsel %vm273_vm0, %v296_v30, 0.0  ;;  %v308_v33 = vsel %vm273_vm0, %v298_v31, 0.0 }
  0xdc   : > { %306 = vadd.xlane.f32.xlu0 %v305_v29  ;;  %303 = vadd.xlane.f32.xlu1 %v302_v32 }
  0xe0   : > { %309 = vadd.xlane.f32.xlu1 %v308_v33 }
 0x161   : > { %v301_v34 = vpop.xlane.xlu0 %300 }
 0x162   : > { %v311_v35 = vmul.f32 0.03125, %v301_v34 }
 0x164   : > { %v315_v36 = vadd.f32 1e-05, %v311_v35 }
 0x165   : > { %v304_v37 = vpop.xlane.xlu1 %303  ;;  %v307_v38 = vpop.xlane.xlu0 %306 }
 0x166   : > { %571 = vrsqrt.f32 %v315_v36  ;;  %v312_v39 = vmul.f32 0.03125, %v304_v37  ;;  %v313_v40 = vmul.f32 0.03125, %v307_v38 }
 0x168   : > { %v316_v41 = vadd.f32 1e-05, %v312_v39  ;;  %v317_v42 = vadd.f32 1e-05, %v313_v40 }
 0x169   : > { %v310_v43 = vpop.xlane.xlu1 %309 }
 0x16a   : > { %573 = vrsqrt.f32 %v316_v41  ;;  %v314_v44 = vmul.f32 0.03125, %v310_v43 }
 0x16b   : > { %575 = vrsqrt.f32 %v317_v42 }
 0x16c   : > { %v318_v45 = vadd.f32 1e-05, %v314_v44 }
 0x16e   : > { %577 = vrsqrt.f32 %v318_v45 }
 0x173   : > { %v572_v46 = vpop.eup %571 }
 0x174   : > { %v325_v48 = vmul.f32 %v572_v46, %v291_v18 }
 0x176   : > { %v335_v50 = vmul.f32 %v482_v47, %v325_v48 }
 0x177   : > { %v574_v51 = vpop.eup %573 }
 0x178   : > { %v576_v52 = vpop.eup %575  ;;  %v345_v53 = vadd.f32 %v483_v49, %v335_v50  ;;  %v326_v54 = vmul.f32 %v574_v51, %v292_v26 }
 0x179   : > { %v327_v55 = vmul.f32 %v576_v52, %v293_v19 }
 0x17a   : > { %v336_v56 = vmul.f32 %v482_v47, %v326_v54  ;;  %349 = vst.msk [vmem:[%s257_s8] sm:$0xff] %vm273_vm0, %v345_v53 }
 0x17b   : > { %v578_v57 = vpop.eup %577  ;;  %v337_v58 = vmul.f32 %v482_v47, %v327_v55 }
 0x17c   : > { %v346_v59 = vadd.f32 %v483_v49, %v336_v56  ;;  %v328_v60 = vmul.f32 %v578_v57, %v294_v27 }
 0x17d   : > { %v347_v61 = vadd.f32 %v483_v49, %v337_v58 }
 0x17e   : > { %v338_v62 = vmul.f32 %v482_v47, %v328_v60  ;;  %350 = vst.msk [vmem:[%s257_s8 + $0x8] sm:$0xff] %vm273_vm0, %v346_v59 }
 0x17f   : > { %351 = vst.msk [vmem:[%s257_s8 + $0x10] sm:$0xff] %vm273_vm0, %v347_v61 }
 0x180   : > { %v348_v63 = vadd.f32 %v483_v49, %v338_v62 }
 0x182   : > { %352 = vst.msk [vmem:[%s257_s8 + $0x18] sm:$0xff] %vm273_vm0, %v348_v63 }
 0x183   : > { %646 = shalt.err (!%p643_p3)
}
 0x184   : > { %s647_s30 = scalar_lea.hbm %s908_s11, 512  ;;  %s651_s25 = scalar_lea.hbm %s962_s4, 2048 }
 0x185   : > { %p648_p5 = scmp.ne.s32.totalorder %s908_s11, %s647_s30  ;;  %p652_p9 = scmp.lt.s32.totalorder %s908_s11, %s962_s4 }
 0x186   : > { %p653_p11 = scmp.lt.s32.totalorder %s651_s25, %s647_s30 }
 0x187   : > { %p649_p7 = pnand %p648_p5, %p979_p4 }
 0x188   : > { %p654_p10 = por %p653_p11, %p652_p9 }
 0x189   : > { %p650_p6 = pneg %p649_p7 }
 0x18b   : > { %p655_p1 = pnand %p654_p10, %p650_p6 }
 0x18d   : > { %658 = shalt.err (!%p655_p1)
}
 0x18e   : > { %s724_s8 = smov 128   ;;  %s725_s9 = smov 8  }
 0x18f   : > { %500 = dma.vmem_to_hbm [thread:$0]  (%p979_p4), %s910_s10, 512, %s908_s11, %s354_s18, %s724_s8, %s724_s8, %s725_s9  }
 0x190 PF: > { %p517_p8 = scmp.ge.s32.totalorder %s717_s20, 2  ;;  %s385_s24 = sand.u32 1, %s697_s15  }
 0x191   : > { %p980_p12 = scmp.ne.s32.totalorder %s970_s26, 0  ;;  %s386_s14 = scalar_lea.sflag [#allocation4], %s385_s24 }
 0x193   : > { %p511_p13 = pnand %p517_p8, %p980_p12 }
 0x195   : > { %p512_p0 = pneg %p511_p13 }
 0x197   : > { %692 = dma.done.wait (%p512_p0), %s386_s14, 512  }
 0x198   : > { %694 = vsyncadd (%p512_p0), %s386_s14, 4294966784  ;;  %s21_s20 = sadd.s32 1, %s717_s20   ;;  %s981_s15 = smov %s701_s16 }
 0x199   : > { %p18_p2 = scmp.ge.s32.totalorder %s21_s20, 6   ;;  %s982_s16 = smov %s705_s17 }
 0x19a   : > { %s983_s17 = smov %s849_s28  ;;  %s984_s18 = smov %s713_s19 }
 0x19b   : > { %s985_s19 = smov %s987_s5  ;;  %20 = sbr.rel (!%p18_p2) target bundleno = 9 (0x9), region = 86 }
 0x1a0   :  { %391 = vsyncpa [#allocation3], 1 }
 0x1a1   :  { %393 = vsyncpa [#allocation3 + $0x1], 1 }
 0x1a2   :  { %394 = vsyncpa [#allocation6], 1 }
 0x1a3   :  { %395 = vsyncpa [#allocation4], 1 }
 0x1a4   :  { %397 = vsyncpa [#allocation4 + $0x1], 1 }

</bundles_post_ra>
